<compile_context>
chip_gen: v6e
topology: v6e:2x2x1
jax: 0.10.0
libtpu: 0.0.40
codegen_flags: <defaults>
</compile_context>

<pallas_src>
import jax
import jax.numpy as jnp
from jax.experimental import pallas as pl
from jax.experimental.pallas import tpu as pltpu


_VMEM_LIMIT_BYTES = 56 * 1024 * 1024  # <= v7x physical 64 MiB, > v5e/v6e defaults


def _conv_kernel(x_ref,            # VMEM (C, HW)        bf16 input (one batch)
                 w_ref,            # VMEM (2Cr+C, C)     bf16 fused conv weights
                 b_ref,            # VMEM (2Cr+C, 1)     f32 fused biases
                 a_ref,            # VMEM (2Cr+C, 1)     f32 fused PReLU slopes
                 e1_ref,           # VMEM (Cr, HW)       bf16 out (query embed)
                 e2_ref,           # VMEM (Cr, HW)       bf16 out (key embed)
                 xa_ref):          # VMEM (C,  HW)       bf16 out (values)
    cr = e1_ref.shape[0]
    # Fused 1x1 convs == one channel matmul (bf16 MXU inputs, f32 accumulate).
    y = jnp.dot(w_ref[...], x_ref[...], preferred_element_type=jnp.float32)
    y = y + b_ref[...]
    y = jnp.where(y >= 0, y, a_ref[...] * y)          # PReLU (per-conv slope)
    e1_ref[...] = y[:cr, :].astype(e1_ref.dtype)
    e2_ref[...] = y[cr:2 * cr, :].astype(e2_ref.dtype)
    xa_ref[...] = y[2 * cr:, :].astype(xa_ref.dtype)


def _attn_kernel(e1_ref,           # VMEM (Cr, TQ)  bf16  query-tile embeddings
                 e2t_ref,          # VMEM (HW, Cr)  bf16  key embeddings (pre-T)
                 xa_ref,           # VMEM (C,  HW)  bf16  values
                 out_ref):         # VMEM (C,  TQ)  f32
    # score^T[k, q] = <e2[:, k], e1[:, q]>  : canonical (HW,Cr)x(Cr,TQ) matmul.
    s = jnp.dot(e2t_ref[...], e1_ref[...], preferred_element_type=jnp.float32)
    # Exact softmax over keys (all keys resident), keys on sublanes.
    s = s - jnp.max(s, axis=0, keepdims=True)          # (HW, TQ)
    p = jnp.exp(s)                                     # f32 EUP
    l = jnp.sum(p, axis=0, keepdims=True)              # (1, TQ)
    # Unnormalized aggregation: canonical (C,HW)x(HW,TQ) matmul, bf16 operands.
    acc = jnp.dot(xa_ref[...], p.astype(jnp.bfloat16),
                  preferred_element_type=jnp.float32)  # (C, TQ)
    # Deferred softmax normalization: C-wide multiply by EUP reciprocal.
    out_ref[...] = (acc * pl.reciprocal(l, approx=True)).astype(out_ref.dtype)


def non_local_attention(x_nchw, params, *, tq=256):
    """x_nchw: (N, C, H, W) float32.  Returns (N, C, H, W) float32."""
    N, C, H, W = x_nchw.shape
    HW = H * W
    Cr = params["w1"].shape[0]

    # NCHW -> (N, C, HW): pure reshape; ship as bf16 (halves DMA, MXU-friendly).
    x = x_nchw.reshape(N, C, HW).astype(jnp.bfloat16)

    a1 = params["alphas"][0]
    a2 = params["alphas"][1]
    aa = params["alphas"][2]

    # Fuse the three 1x1 convs into a single matmul.
    wcat = jnp.concatenate([params["w1"], params["w2"], params["wa"]],
                           axis=0).astype(jnp.bfloat16)          # (2Cr+C, C)
    bcat = jnp.concatenate([params["b1"], params["b2"], params["ba"]],
                           axis=0).astype(jnp.float32)           # (2Cr+C, 1)
    slopes = jnp.concatenate(
        [jnp.broadcast_to(a1, (Cr, 1)),
         jnp.broadcast_to(a2, (Cr, 1)),
         jnp.broadcast_to(aa, (C, 1))], axis=0).astype(jnp.float32)

    # ---- Stage 1: per-batch 1x1 convs (hoisted out of the query loop). ----
    e1, e2, xa = pl.pallas_call(
        _conv_kernel,
        out_shape=(jax.ShapeDtypeStruct((N, Cr, HW), jnp.bfloat16),
                   jax.ShapeDtypeStruct((N, Cr, HW), jnp.bfloat16),
                   jax.ShapeDtypeStruct((N, C, HW), jnp.bfloat16)),
        grid=(N,),
        in_specs=[
            pl.BlockSpec((None, C, HW), lambda n: (n, 0, 0)),    # x
            pl.BlockSpec((2 * Cr + C, C), lambda n: (0, 0)),     # wcat
            pl.BlockSpec((2 * Cr + C, 1), lambda n: (0, 0)),     # bcat
            pl.BlockSpec((2 * Cr + C, 1), lambda n: (0, 0)),     # slopes
        ],
        out_specs=(
            pl.BlockSpec((None, Cr, HW), lambda n: (n, 0, 0)),   # e1
            pl.BlockSpec((None, Cr, HW), lambda n: (n, 0, 0)),   # e2
            pl.BlockSpec((None, C, HW), lambda n: (n, 0, 0)),    # xa
        ),
        compiler_params=pltpu.CompilerParams(
            dimension_semantics=("parallel",),
            vmem_limit_bytes=_VMEM_LIMIT_BYTES),
    )(x, wcat, bcat, slopes)

    # One-time layout plumbing so the attention matmuls need no in-kernel
    # transposes: e2^T has keys on sublanes, channels on lanes.
    e2t = jnp.swapaxes(e2, 1, 2)                                 # (N, HW, Cr)

    # Query tiling: tq multiple of 128 (256 fills the v6e/v7x MXU); pad only
    # the query axis for non-divisible spatial sizes (keys stay exact, so the
    # softmax is exact; padded query columns are garbage and sliced off).
    tq = max(128, (tq // 128) * 128)
    hw_pad = pl.cdiv(HW, 128) * 128
    tq = min(tq, hw_pad)
    hw_q = pl.cdiv(HW, tq) * tq
    nq = hw_q // tq
    if hw_q > HW:
        e1 = jnp.pad(e1, ((0, 0), (0, 0), (0, hw_q - HW)))

    # ---- Stage 2: score / softmax / aggregation. ----
    out = pl.pallas_call(
        _attn_kernel,
        out_shape=jax.ShapeDtypeStruct((N, C, hw_q), jnp.float32),
        grid=(N, nq),
        in_specs=[
            pl.BlockSpec((None, Cr, tq), lambda n, q: (n, 0, q)),  # e1 tile
            pl.BlockSpec((None, HW, Cr), lambda n, q: (n, 0, 0)),  # e2^T (all keys)
            pl.BlockSpec((None, C, HW), lambda n, q: (n, 0, 0)),   # values
        ],
        out_specs=pl.BlockSpec((None, C, tq), lambda n, q: (n, 0, q)),
        compiler_params=pltpu.CompilerParams(
            dimension_semantics=("parallel", "parallel"),
            vmem_limit_bytes=_VMEM_LIMIT_BYTES),
    )(e1, e2t, xa)

    if hw_q > HW:
        out = out[:, :, :HW]
    return out.reshape(N, C, H, W)                               # pure reshape


def _reference(x_nchw, params):
    """Pure-JAX f32 reference mirroring the PyTorch forward."""
    N, C, H, W = x_nchw.shape
    HW = H * W
    x = jnp.transpose(x_nchw, (0, 2, 3, 1)).reshape(N, HW, C)

    def prelu(y, a):
        return jnp.where(y >= 0, y, a * y)

    a1, a2, aa = params["alphas"]
    e1 = prelu(x @ params["w1"].T + params["b1"].T, a1)      # (N, HW, Cr)
    e2 = prelu(x @ params["w2"].T + params["b2"].T, a2)      # (N, HW, Cr)
    xa = prelu(x @ params["wa"].T + params["ba"].T, aa)      # (N, HW, C)
    score = jnp.einsum("nqc,nkc->nqk", e1, e2)               # (N, HW, HW)
    score = jax.nn.softmax(score, axis=-1)
    out = jnp.einsum("nqk,nkc->nqc", score, xa)              # (N, HW, C)
    return jnp.transpose(out, (0, 2, 1)).reshape(N, C, H, W)


def init_params(key, channel, reduction):
    """Deterministic synthetic parameters (matches module shapes; PReLU 0.25)."""
    Cr = channel // reduction
    k1, k2, k3, k4, k5, k6 = jax.random.split(key, 6)
    scale = 0.1
    # 1x1 conv weights stored as (C_out, C_in): y = w @ x in channel-first layout.
    return {
        "w1": (scale * jax.random.normal(k1, (Cr, channel))).astype(jnp.float32),
        "b1": (scale * jax.random.normal(k2, (Cr, 1))).astype(jnp.float32),
        "w2": (scale * jax.random.normal(k3, (Cr, channel))).astype(jnp.float32),
        "b2": (scale * jax.random.normal(k4, (Cr, 1))).astype(jnp.float32),
        "wa": (scale * jax.random.normal(k5, (channel, channel))).astype(jnp.float32),
        "ba": (scale * jax.random.normal(k6, (channel, 1))).astype(jnp.float32),
        "alphas": jnp.full((3,), 0.25, dtype=jnp.float32),   # nn.PReLU() default
    }


if __name__ == "__main__":
    key = jax.random.PRNGKey(0)
    kx, kp = jax.random.split(key)

    # Small shapes consistent with the module (channel divisible by reduction=2).
    N, C, H, W = 2, 8, 16, 16
    reduction = 2

    x = jax.random.normal(kx, (N, C, H, W), dtype=jnp.float32)
    params = init_params(kp, C, reduction)

    out = jax.block_until_ready(non_local_attention(x, params))

    ref = _reference(x, params)
    assert out.shape == (N, C, H, W)
    # bf16 activations/weights on the MXU (f32 accumulation) + approx reciprocal
    # -> loosened tolerance vs the pure-f32 reference.
    assert jnp.allclose(out, ref, atol=3e-2, rtol=3e-2), "mismatch vs JAX reference"

    print("KERNEL_OK")
</pallas_src>

<mosaic_0001>
module attributes {stable_mosaic.version = 11 : i64} {
  func.func @_conv_kernel(%arg0: i32, %arg1: memref<1x8x256xbf16, #tpu.memory_space<vmem>>, %arg2: memref<16x8xbf16, #tpu.memory_space<vmem>>, %arg3: memref<16x1xf32, #tpu.memory_space<vmem>>, %arg4: memref<16x1xf32, #tpu.memory_space<vmem>>, %arg5: memref<1x4x256xbf16, #tpu.memory_space<vmem>>, %arg6: memref<1x4x256xbf16, #tpu.memory_space<vmem>>, %arg7: memref<1x8x256xbf16, #tpu.memory_space<vmem>>) attributes {dimension_semantics = [#tpu.dimension_semantics<parallel>], iteration_bounds = array<i64: 2>, scalar_prefetch = 0 : i64, scratch_operands = 0 : i64, tpu.core_type = #tpu.core_type<tc>, window_params = [{transform_indices = @transform_0, window_bounds = array<i64: 1, 8, 256>}, {pipeline_mode = #tpu.pipeline_mode<synchronous>, transform_indices = @transform_1, window_bounds = array<i64: 16, 8>}, {pipeline_mode = #tpu.pipeline_mode<synchronous>, transform_indices = @transform_2, window_bounds = array<i64: 16, 1>}, {pipeline_mode = #tpu.pipeline_mode<synchronous>, transform_indices = @transform_3, window_bounds = array<i64: 16, 1>}, {transform_indices = @transform_4, window_bounds = array<i64: 1, 4, 256>}, {transform_indices = @transform_5, window_bounds = array<i64: 1, 4, 256>}, {transform_indices = @transform_6, window_bounds = array<i64: 1, 8, 256>}]} {
    %c0 = arith.constant 0 : index
    %c0_0 = arith.constant 0 : index
    %0 = vector.load %arg2[%c0, %c0_0] : memref<16x8xbf16, #tpu.memory_space<vmem>>, vector<16x8xbf16>
    %c0_1 = arith.constant 0 : index
    %c0_2 = arith.constant 0 : index
    %c0_3 = arith.constant 0 : index
    %1 = vector.load %arg1[%c0_1, %c0_2, %c0_3] : memref<1x8x256xbf16, #tpu.memory_space<vmem>>, vector<1x8x256xbf16>
    %2 = vector.shape_cast %1 : vector<1x8x256xbf16> to vector<8x256xbf16>
    %cst = arith.constant dense<0.000000e+00> : vector<16x256xf32>
    %3 = tpu.matmul %0, %2, %cst {dimension_numbers = #tpu.dot_dimension_numbers<[1], [0], [0], [1], [0, 0, 1, 1], [], []>} : vector<16x8xbf16>, vector<8x256xbf16>, vector<16x256xf32> -> vector<16x256xf32>
    %c0_4 = arith.constant 0 : index
    %c0_5 = arith.constant 0 : index
    %4 = vector.load %arg3[%c0_4, %c0_5] : memref<16x1xf32, #tpu.memory_space<vmem>>, vector<16x1xf32>
    %5 = vector.broadcast %4 : vector<16x1xf32> to vector<16x256xf32>
    %6 = arith.addf %3, %5 : vector<16x256xf32>
    %cst_6 = arith.constant 0.000000e+00 : f32
    %7 = vector.broadcast %cst_6 : f32 to vector<16x256xf32>
    %8 = arith.cmpf oge, %6, %7 : vector<16x256xf32>
    %c0_7 = arith.constant 0 : index
    %c0_8 = arith.constant 0 : index
    %9 = vector.load %arg4[%c0_7, %c0_8] : memref<16x1xf32, #tpu.memory_space<vmem>>, vector<16x1xf32>
    %10 = vector.broadcast %9 : vector<16x1xf32> to vector<16x256xf32>
    %11 = arith.mulf %10, %6 : vector<16x256xf32>
    %12 = arith.select %8, %6, %11 : vector<16x256xi1>, vector<16x256xf32>
    %13 = vector.extract_strided_slice %12 {offsets = [0, 0], sizes = [4, 256], strides = [1, 1]} : vector<16x256xf32> to vector<4x256xf32>
    %14 = arith.truncf %13 : vector<4x256xf32> to vector<4x256xbf16>
    %c0_9 = arith.constant 0 : index
    %c0_10 = arith.constant 0 : index
    %c0_11 = arith.constant 0 : index
    %15 = vector.load %arg5[%c0_9, %c0_10, %c0_11] : memref<1x4x256xbf16, #tpu.memory_space<vmem>>, vector<1x4x256xbf16>
    %16 = vector.shape_cast %15 : vector<1x4x256xbf16> to vector<4x256xbf16>
    %17 = vector.shape_cast %14 : vector<4x256xbf16> to vector<1x4x256xbf16>
    tpu.vector_store %arg5[%c0_9, %c0_10, %c0_11], %17 {strides = array<i32>} : memref<1x4x256xbf16, #tpu.memory_space<vmem>>, vector<1x4x256xbf16>,
    %18 = vector.extract_strided_slice %12 {offsets = [4, 0], sizes = [4, 256], strides = [1, 1]} : vector<16x256xf32> to vector<4x256xf32>
    %19 = arith.truncf %18 : vector<4x256xf32> to vector<4x256xbf16>
    %c0_12 = arith.constant 0 : index
    %c0_13 = arith.constant 0 : index
    %c0_14 = arith.constant 0 : index
    %20 = vector.load %arg6[%c0_12, %c0_13, %c0_14] : memref<1x4x256xbf16, #tpu.memory_space<vmem>>, vector<1x4x256xbf16>
    %21 = vector.shape_cast %20 : vector<1x4x256xbf16> to vector<4x256xbf16>
    %22 = vector.shape_cast %19 : vector<4x256xbf16> to vector<1x4x256xbf16>
    tpu.vector_store %arg6[%c0_12, %c0_13, %c0_14], %22 {strides = array<i32>} : memref<1x4x256xbf16, #tpu.memory_space<vmem>>, vector<1x4x256xbf16>,
    %23 = vector.extract_strided_slice %12 {offsets = [8, 0], sizes = [8, 256], strides = [1, 1]} : vector<16x256xf32> to vector<8x256xf32>
    %24 = arith.truncf %23 : vector<8x256xf32> to vector<8x256xbf16>
    %c0_15 = arith.constant 0 : index
    %c0_16 = arith.constant 0 : index
    %c0_17 = arith.constant 0 : index
    %25 = vector.load %arg7[%c0_15, %c0_16, %c0_17] : memref<1x8x256xbf16, #tpu.memory_space<vmem>>, vector<1x8x256xbf16>
    %26 = vector.shape_cast %25 : vector<1x8x256xbf16> to vector<8x256xbf16>
    %27 = vector.shape_cast %24 : vector<8x256xbf16> to vector<1x8x256xbf16>
    tpu.vector_store %arg7[%c0_15, %c0_16, %c0_17], %27 {strides = array<i32>} : memref<1x8x256xbf16, #tpu.memory_space<vmem>>, vector<1x8x256xbf16>,
    return
  }
  func.func @transform_0(%arg0: i32) -> (i32, i32, i32) {
    %c0_i32 = arith.constant 0 : i32
    %c0_i32_0 = arith.constant 0 : i32
    %c0_i32_1 = arith.constant 0 : i32
    return %arg0, %c0_i32, %c0_i32_0 : i32, i32, i32
  }
  func.func @transform_1(%arg0: i32) -> (i32, i32) {
    %c0_i32 = arith.constant 0 : i32
    %c0_i32_0 = arith.constant 0 : i32
    %c0_i32_1 = arith.constant 0 : i32
    return %c0_i32, %c0_i32_0 : i32, i32
  }
  func.func @transform_2(%arg0: i32) -> (i32, i32) {
    %c0_i32 = arith.constant 0 : i32
    %c0_i32_0 = arith.constant 0 : i32
    %c0_i32_1 = arith.constant 0 : i32
    return %c0_i32, %c0_i32_0 : i32, i32
  }
  func.func @transform_3(%arg0: i32) -> (i32, i32) {
    %c0_i32 = arith.constant 0 : i32
    %c0_i32_0 = arith.constant 0 : i32
    %c0_i32_1 = arith.constant 0 : i32
    return %c0_i32, %c0_i32_0 : i32, i32
  }
  func.func @transform_4(%arg0: i32) -> (i32, i32, i32) {
    %c0_i32 = arith.constant 0 : i32
    %c0_i32_0 = arith.constant 0 : i32
    %c0_i32_1 = arith.constant 0 : i32
    return %arg0, %c0_i32, %c0_i32_0 : i32, i32, i32
  }
  func.func @transform_5(%arg0: i32) -> (i32, i32, i32) {
    %c0_i32 = arith.constant 0 : i32
    %c0_i32_0 = arith.constant 0 : i32
    %c0_i32_1 = arith.constant 0 : i32
    return %arg0, %c0_i32, %c0_i32_0 : i32, i32, i32
  }
  func.func @transform_6(%arg0: i32) -> (i32, i32, i32) {
    %c0_i32 = arith.constant 0 : i32
    %c0_i32_0 = arith.constant 0 : i32
    %c0_i32_1 = arith.constant 0 : i32
    return %arg0, %c0_i32, %c0_i32_0 : i32, i32, i32
  }
}

</mosaic_0001>

<bundles_post_ra>
// kernel: tpu_custom_call.1
= control target key start
LH: loop header
LB: loop body
LE: loop exit
PB: predicated region body
PF: predicated region fallthrough
CT: control target
= control target key end

     0   :  { %12 = vsyncpa [#allocation3], 0  ;;  %s1021_s0 = inlined_call_operand.vmem [shape: bf16[2,8,256], index: 0, kind: input, shape index: {}]   ;;  %s1022_s1 = inlined_call_operand.vmem [shape: bf16[16,8], index: 1, kind: input, shape index: {}]   ;;  %s1023_s2 = inlined_call_operand.vmem [shape: f32[16,1], index: 2, kind: input, shape index: {}]   ;;  %s1024_s3 = inlined_call_operand.vmem [shape: f32[16,1], index: 3, kind: input, shape index: {}]   ;;  %s1025_s4 = inlined_call_operand.hbm [shape: bf16[2,4,256], index: 4, kind: output, shape index: {0}]   ;;  %s1026_s5 = inlined_call_operand.hbm [shape: bf16[2,4,256], index: 5, kind: output, shape index: {1}]   ;;  %s1027_s6 = inlined_call_operand.hbm [shape: bf16[2,8,256], index: 6, kind: output, shape index: {2}]  }
   0x1   :  { %14 = vsyncpa [#allocation3 + $0x1], 0 }
   0x2   :  { %15 = vsyncpa [#allocation5], 0 }
   0x3   :  { %17 = vsyncpa [#allocation5 + $0x1], 0  ;;  %s818_s21 = smov 0   ;;  %s820_s22 = smov 0  }
   0x4   :  { %s822_s23 = smov 0   ;;  %s824_s24 = smov 0  }
   0x5 LB: > { %s839_s25 = sadd.s32 4294967295, %s776_s24   ;;  %s1028_s26 = sadd.s32 4294967294, %s776_s24   ;;  %s776_s24 = sphi %s824_s24, %s1039_s24   ;;  %s772_s23 = sphi %s822_s23, %s1038_s23   ;;  %s768_s22 = sphi %s820_s22, %s1037_s22   ;;  %s764_s21 = sphi %s818_s21, %s1036_s21  }
   0x6   : > { %s843_s27 = sadd.s32 1, %s776_s24   ;;  %s119_s28 = sadd.s32 1, %s772_s23 }
   0x7   : > { %s116_s29 = ssub.s32 %s776_s24, %s843_s27  ;;  %p129_p0 = scmp.ne.s32.totalorder %s772_s23, %s768_s22 }
   0x8   : > { %p117_p1 = scmp.eq.s32.totalorder %s116_s29, 0  ;;  %p130_p2 = scmp.eq.s32.totalorder %s839_s25, 1 }
   0x9   : > { %p135_p3 = scmp.ne.s32.totalorder %s768_s22, %s764_s21  ;;  %p136_p4 = scmp.eq.s32.totalorder %s1028_s26, 1 }
   0xa   : > { %s856_s30 = scalar_select %p117_p1, %s772_s23, %s119_s28  }
   0xb   : > { %p858_p5 = por %p130_p2, %p129_p0  ;;  %p862_p6 = por %p136_p4, %p135_p3 }
   0xc   : > { %p574_p7 = scmp.ge.s32.totalorder %s776_s24, 1  ;;  %p223_p8 = scmp.lt.s32.totalorder %s776_s24, 3 }
   0xe   : > { %p224_p9 = pnand %p574_p7, %p223_p8 }
   0xf   : > { %p263_p10 = scmp.lt.s32.totalorder (!%p224_p9), %s839_s25, 1  ;;  %s889_s10 = sand.u32 (!%p224_p9), 1, %s768_s22  }
  0x10   : > { %227 = sbr.rel (%p224_p9) target bundleno = 294 (0x126), region = 36  ;;  %s577_s12 = sshll.u32 (!%p224_p9), %s889_s10, 3 }
  0x11   : > { %s601_s13 = sshll.u32 (!%p224_p9), %s839_s25, 6  ;;  %s908_s9 = scalar_lea.vmem (!%p224_p9), [#allocation6], %s577_s12 }
  0x12   : > { %s900_s19 = scalar_lea.hbm (!%p224_p9), %s1025_s4, %s601_s13  ;;  %s399_s18 = scalar_lea.sflag (!%p224_p9), [#allocation3], %s889_s10 }
  0x15   : > { %v778_v0 = vmov 0   ;;  %v272_v1 = vld [vmem:[%s1023_s2] sm:$0xff]  ;;  %s264_s11 = scalar_select %p263_p10, %s839_s25, 1  ;;  %v273_v2 = vld [vmem:[%s1023_s2 + $0x8] sm:$0xff]  ;;  %vm298_vm0 = vcmask 1043456   ;;  %vm294_vm1 = vcmask 64512   ;;  %v380_v14 = vlaneseq }
  0x16   : > { %337 = vmatprep.mubr.bf16.mxu0 %v778_v0  ;;  %655 = vset.pattern.permute.xlu0 %v778_v0  ;;  %v352_v3 = vld [vmem:[%s1024_s3] sm:$0xff]  ;;  %v353_v4 = vld [vmem:[%s1024_s3 + $0x8] sm:$0xff]  ;;  %v779_v12 = vmov 1983009808  }
  0x17   : > { %276 = vperm.xlu0 %655, %v272_v1   ;;  %656 = vset.pattern.permute.xlu1 %v778_v0  ;;  %s599_s16 = sshll.u32 %s264_s11, 3  ;;  %v659_v9 = vld [vmem:[%s1022_s1] sm:$0xff]   ;;  %v378_v13 = vunpack.c.l.s4 %v779_v12  ;;  %s575_s11 = sshll.u32 %s889_s10, 2  ;;  %v381_v20 = vshrl.u32 %v380_v14, 7 }
  0x18   : > { %281 = vperm.xlu1 %656, %v273_v2   ;;  %s267_s28 = scalar_lea.vmem %s1021_s0, %s599_s16  ;;  %s248_s14 = scalar_lea.vmem [#allocation2], %s575_s11 }
  0x19   : > { %v271_v5 = vld [vmem:[%s267_s28] sm:$0xff]  ;;  %v379_v19 = vunpack.c.0.s8 %v378_v13  ;;  %s423_s15 = sshll.u32 %s248_s14, 4  ;;  %s904_s20 = scalar_lea.vmem [#allocation4], %s575_s11  ;;  %s902_s15 = int_to_ptr.vmem [resolvable:$true] %s423_s15 }
  0x1a   : > { %v582_v6 = vcombine.high %v271_v5, %v271_v5  ;;  %v581_v7 = vcombine.low %v271_v5, %v271_v5  ;;  %s660_s26 = scalar_lea.vmem %s902_s15, 64  ;;  %s780_s11 = smov [#allocation2]  }
  0x1b   : > { %356 = vperm.xlu0 %655, %v352_v3   ;;  %v382_v28 = vsub.s32 %v379_v19, %v381_v20  ;;  %p661_p11 = scmp.ne.s32.totalorder %s902_s15, %s660_s26  ;;  %s664_s16 = sshll.u32 %s780_s11, 4  ;;  %s665_s16 = int_to_ptr.vmem [resolvable:$false] %s664_s16 }
  0x1c   : > { %361 = vperm.xlu1 %656, %v353_v4   ;;  %583 = vmatprep.subr.msk.bf16.mxu0 %vm298_vm0, %v582_v6  ;;  %v300_v8 = vsel %vm298_vm0, %v581_v7, 0  ;;  %s666_s28 = scalar_lea.vmem %s665_s16, 128  ;;  %p667_p0 = scmp.lt.s32.totalorder %s902_s15, %s665_s16 }
  0x1d   : > { %320 = vmatpush1.bf16.msra.mxu0 %v300_v8  ;;  %p662_p12 = pnand %p661_p11, %p858_p5  ;;  %p668_p1 = scmp.lt.s32.totalorder %s666_s28, %s660_s26 }
  0x1f   : > { %p663_p13 = pneg %p662_p12  ;;  %p669_p2 = por %p668_p1, %p667_p0 }
  0x20   : > { %584 = vmatmul.mubr.msk.bf16.vlgmr.msra.gmra.mxu0 %vm294_vm1, %v659_v9 }
  0x21   : > { %p670_p3 = pnand %p669_p2, %p663_p13 }
  0x92   : > { %v277_v10 = vpop.permute.xlu0 %276 }
  0x93   : > { %v282_v11 = vpop.permute.xlu1 %281 }
  0x96   : > { %v357_v17 = vpop.permute.xlu0 %356 }
  0x97   : > { %v362_v24 = vpop.permute.xlu1 %361 }
  0xe0   : > { %v339_v15 = vpop.f32.mrf.mxu0 }
  0xe1   : > { %v340_v16 = vadd.f32 %v339_v15, %v277_v10 }
  0xe2   : > { %v341_v18 = vpop.f32.mrf.mxu0 }
  0xe3   : > { %v364_v21 = vmul.f32 %v357_v17, %v340_v16  ;;  %v342_v22 = vadd.f32 %v341_v18, %v277_v10  ;;  %vm348_vm2 = vcmp.ge.f32.partialorder %v340_v16, 0.0 }
  0xe4   : > { %v343_v23 = vpop.f32.mrf.mxu0 }
  0xe5   : > { %vm349_vm3 = vcmp.ge.f32.partialorder %v342_v22, 0.0  ;;  %v365_v25 = vmul.f32 %v357_v17, %v342_v22  ;;  %v344_v26 = vadd.f32 %v343_v23, %v282_v11  ;;  %v368_v29 = vsel %vm348_vm2, %v340_v16, %v364_v21 }
  0xe6   : > { %v345_v27 = vpop.f32.mrf.mxu0 }
  0xe7   : > { %v369_v30 = vsel %vm349_vm3, %v342_v22, %v365_v25  ;;  %v366_v31 = vmul.f32 %v362_v24, %v344_v26  ;;  %v346_v32 = vadd.f32 %v345_v27, %v282_v11  ;;  %vm350_vm4 = vcmp.ge.f32.partialorder %v344_v26, 0.0 }
  0xe8   : > { %v585_v33 = vpack.c.bf16 %v369_v30, %v368_v29 }
  0xe9   : > { %vm351_vm5 = vcmp.ge.f32.partialorder %v346_v32, 0.0  ;;  %v367_v34 = vmul.f32 %v362_v24, %v346_v32  ;;  %v370_v36 = vsel %vm350_vm4, %v344_v26, %v366_v31 }
  0xea   : > { %v383_v35 = vrot.slane %v585_v33, %v382_v28  ;;  %586 = vst.sshfl [vmem:[%s248_s14] sm:$0x33 pattern:$0x76325410] %v585_v33 }
  0xeb   : > { %v371_v37 = vsel %vm351_vm5, %v346_v32, %v367_v34 }
  0xec   : > { %673 = shalt.err (!%p670_p3)
}
  0xed   : > { %s674_s12 = scalar_lea.hbm %s900_s19, 64  ;;  %s678_s11 = scalar_lea.hbm %s1025_s4, 128 }
  0xee   : > { %p675_p4 = scmp.ne.s32.totalorder %s900_s19, %s674_s12  ;;  %p679_p9 = scmp.lt.s32.totalorder %s900_s19, %s1025_s4 }
  0xef   : > { %p680_p10 = scmp.lt.s32.totalorder %s678_s11, %s674_s12 }
  0xf0   : > { %p676_p7 = pnand %p675_p4, %p858_p5 }
  0xf1   : > { %p681_p11 = por %p680_p10, %p679_p9 }
  0xf2   : > { %p677_p8 = pneg %p676_p7 }
  0xf4   : > { %p682_p12 = pnand %p681_p11, %p677_p8 }
  0xf6   : > { %685 = shalt.err (!%p682_p12)
}
  0xf7   : > { %604 = dma.vmem_to_hbm [thread:$0]  (%p858_p5), %s902_s15, 64, %s900_s19, %s399_s18   ;;  %v600_v38 = vpack.c.bf16 %v371_v37, %v370_v36  ;;  %v386_v39 = vcombine.high %v383_v35, %v383_v35 }
  0xf8   : > { %s937_s28 = scalar_lea.hbm %s1026_s5, %s601_s13  ;;  %s1031_s29 = sshll.u32 %s904_s20, 4  ;;  %s941_s29 = int_to_ptr.vmem [resolvable:$true] %s1031_s29 }
  0xf9   : > { %s1032_s17 = sshll.u32 %s839_s25, 7  ;;  %s1033_s15 = sshll.u32 %s908_s9, 4  ;;  %388 = vst [vmem:[%s904_s20] sm:$0xf] %v386_v39  ;;  %397 = vst [vmem:[%s908_s9] sm:$0xff] %v600_v38  ;;  %s952_s15 = int_to_ptr.vmem [resolvable:$true] %s1033_s15 }
  0xfa   : > { %s948_s14 = scalar_lea.hbm %s1027_s6, %s1032_s17  ;;  %s1034_s19 = sand.u32 1, %s839_s25  }
  0xfb   : > { %s958_s13 = scalar_lea.sflag [#allocation5], %s1034_s19  ;;  %s686_s18 = scalar_lea.vmem %s941_s29, 64 }
  0xfc   : > { %p687_p13 = scmp.ne.s32.totalorder %s941_s29, %s686_s18  ;;  %s781_s11 = smov [#allocation4]  }
  0xfd   : > { %s690_s26 = sshll.u32 %s781_s11, 4  ;;  %s691_s26 = int_to_ptr.vmem [resolvable:$false] %s690_s26 }
  0xfe   : > { %p688_p0 = pnand %p687_p13, %p858_p5  ;;  %s692_s16 = scalar_lea.vmem %s691_s26, 128 }
  0xff   : > { %p693_p2 = scmp.lt.s32.totalorder %s941_s29, %s691_s26  ;;  %p694_p3 = scmp.lt.s32.totalorder %s692_s16, %s686_s18 }
 0x100   : > { %p689_p1 = pneg %p688_p0 }
 0x101   : > { %p695_p4 = por %p694_p3, %p693_p2 }
 0x103   : > { %p696_p7 = pnand %p695_p4, %p689_p1 }
 0x105   : > { %699 = shalt.err (!%p696_p7)
}
 0x106   : > { %s700_s25 = scalar_lea.hbm %s937_s28, 64  ;;  %s704_s17 = scalar_lea.hbm %s1026_s5, 128 }
 0x107   : > { %p701_p8 = scmp.ne.s32.totalorder %s937_s28, %s700_s25  ;;  %p705_p11 = scmp.lt.s32.totalorder %s937_s28, %s1026_s5 }
 0x108   : > { %p706_p12 = scmp.lt.s32.totalorder %s704_s17, %s700_s25 }
 0x109   : > { %p702_p9 = pnand %p701_p8, %p858_p5 }
 0x10a   : > { %p707_p13 = por %p706_p12, %p705_p11 }
 0x10b   : > { %p703_p10 = pneg %p702_p9 }
 0x10d   : > { %p708_p0 = pnand %p707_p13, %p703_p10 }
 0x10f   : > { %711 = shalt.err (!%p708_p0)
}
 0x110   : > { %605 = dma.vmem_to_hbm [thread:$0]  (%p858_p5), %s941_s29, 64, %s937_s28, %s958_s13  }
 0x111   : > { %s712_s19 = scalar_lea.vmem %s952_s15, 128  ;;  %s782_s18 = smov [#allocation6]  }
 0x112   : > { %p713_p1 = scmp.ne.s32.totalorder %s952_s15, %s712_s19  ;;  %s716_s11 = sshll.u32 %s782_s18, 4  ;;  %s717_s11 = int_to_ptr.vmem [resolvable:$false] %s716_s11 }
 0x113   : > { %s718_s26 = scalar_lea.vmem %s717_s11, 256  ;;  %p719_p4 = scmp.lt.s32.totalorder %s952_s15, %s717_s11 }
 0x114   : > { %p714_p2 = pnand %p713_p1, %p858_p5  ;;  %p720_p7 = scmp.lt.s32.totalorder %s718_s26, %s712_s19 }
 0x116   : > { %p715_p3 = pneg %p714_p2  ;;  %p721_p8 = por %p720_p7, %p719_p4 }
 0x118   : > { %p722_p9 = pnand %p721_p8, %p715_p3 }
 0x11a   : > { %725 = shalt.err (!%p722_p9)
}
 0x11b   : > { %s726_s16 = scalar_lea.hbm %s948_s14, 128  ;;  %s730_s25 = scalar_lea.hbm %s1027_s6, 256 }
 0x11c   : > { %p727_p10 = scmp.ne.s32.totalorder %s948_s14, %s726_s16  ;;  %p731_p13 = scmp.lt.s32.totalorder %s948_s14, %s1027_s6 }
 0x11d   : > { %p732_p0 = scmp.lt.s32.totalorder %s730_s25, %s726_s16 }
 0x11e   : > { %p728_p11 = pnand %p727_p10, %p858_p5 }
 0x11f   : > { %p733_p1 = por %p732_p0, %p731_p13 }
 0x120   : > { %p729_p12 = pneg %p728_p11 }
 0x122   : > { %p734_p2 = pnand %p733_p1, %p729_p12 }
 0x124   : > { %737 = shalt.err (!%p734_p2)
}
 0x125   : > { %606 = dma.vmem_to_hbm [thread:$0]  (%p858_p5), %s952_s15, 128, %s948_s14, %s958_s13  }
 0x126 PF: > { %p620_p3 = scmp.ge.s32.totalorder %s776_s24, 2  ;;  %s463_s17 = sand.u32 1, %s764_s21  }
 0x127   : > { %s464_s12 = scalar_lea.sflag [#allocation3], %s463_s17 }
 0x128   : > { %p611_p4 = pnand %p620_p3, %p862_p6 }
 0x12a   : > { %p612_p7 = pneg %p611_p4 }
 0x12c   : > { %755 = dma.done.wait (%p612_p7), %s464_s12, 64  }
 0x12d   : > { %757 = vsyncadd (%p612_p7), %s464_s12, 4294967232  ;;  %s1035_s10 = sadd.s32 4294967294, %s776_s24  }
 0x12e   : > { %s472_s19 = sand.u32 1, %s1035_s10  }
 0x12f   : > { %s473_s7 = scalar_lea.sflag [#allocation5], %s472_s19 }
 0x130   : > { %759 = dma.done.wait (%p612_p7), %s473_s7, 192  }
 0x131   : > { %761 = vsyncadd (%p612_p7), %s473_s7, 4294967104  ;;  %p20_p5 = scmp.ge.s32.totalorder %s843_s27, 4   ;;  %s1036_s21 = smov %s768_s22 }
 0x132   : > { %s1037_s22 = smov %s772_s23  ;;  %s1038_s23 = smov %s856_s30 }
 0x133   : > { %s1039_s24 = smov %s843_s27  ;;  %22 = sbr.rel (!%p20_p5) target bundleno = 5 (0x5), region = 103 }
 0x138   :  { %487 = vsyncpa [#allocation3], 1 }
 0x139   :  { %489 = vsyncpa [#allocation3 + $0x1], 1 }
 0x13a   :  { %490 = vsyncpa [#allocation5], 1 }
 0x13b   :  { %492 = vsyncpa [#allocation5 + $0x1], 1 }

</bundles_post_ra>
